<compile_context>
chip_gen: v6e
topology: v6e:2x2x1
jax: 0.10.0
libtpu: 0.0.40
codegen_flags: <defaults>
</compile_context>

<pallas_src>
import functools

import jax
import jax.numpy as jnp
from jax import lax
from jax.experimental import pallas as pl
from jax.experimental.pallas import tpu as pltpu


def _ntk_mlp_kernel(x_ref, *refs, num_hidden):
    # refs = (W1, b1, W2, b2, ..., W_out, b_out, out_ref)
    out_ref = refs[-1]
    params = refs[:-1]

    def first_matmul(w, xb):
        # w: (out, in), xb: (TB, in)  -> contract the `in` axes -> (out, TB).
        # This fuses the x "transpose" into the matmul: activations become
        # feature-major with the batch on the 128-wide lane axis.
        return lax.dot_general(w, xb, (((1,), (1,)), ((), ())),
                               preferred_element_type=jnp.float32)

    alpha = x_ref[...]          # (TB, in) f32, batch-major as stored in HBM
    batch_major = True

    # Hidden layers: relu(W'_l @ alpha + b'_l) with W' = W/fan_in,
    # b' = (1/fan_in + beta) * b pre-folded in the wrapper.
    for l in range(num_hidden):
        w = params[2 * l][...]          # (H_l, in_l) f32 (pre-scaled)
        b = params[2 * l + 1][...]      # (H_l, 1)    f32 (pre-scaled)
        if batch_major:
            h = first_matmul(w, alpha)
            batch_major = False
        else:
            h = jnp.dot(w, alpha, preferred_element_type=jnp.float32)
        alpha = jnp.maximum(h + b, 0.0)                     # (H_l, TB) f32

    # Output layer: plain affine, no scaling / activation.
    w_out = params[2 * num_hidden][...]     # (out_dim, prev) f32
    b_out = params[2 * num_hidden + 1][...] # (out_dim, 1)    f32
    if batch_major:  # num_hidden == 0 degenerate case
        h = first_matmul(w_out, alpha)
    else:
        h = jnp.dot(w_out, alpha, preferred_element_type=jnp.float32)
    out_ref[...] = (h + b_out).astype(out_ref.dtype)        # (out_dim, TB) lane-dense


def _round_up(a, b):
    return (a + b - 1) // b * b


def ntk_choice_forward(x, hidden_weights, hidden_biases, w_out, b_out, *, beta,
                       batch_tile=32768, feature_major_output=False):
    """NTKChoiceModel.forward.

    x: (N, input_dim) f32 (batch-major, streamed as-is — no wrapper transpose/cast).
    hidden_weights[l]: (H_l, in_l)  -- PyTorch nn.Linear (out, in) layout.
    hidden_biases[l]:  (H_l,)
    w_out: (output_dim, prev), b_out: (output_dim,)
    Returns (N, output_dim) f32 utilities (or (output_dim, N) if
    feature_major_output=True, which avoids the trailing transpose entirely).
    """
    n, input_dim = x.shape
    output_dim = int(w_out.shape[0])
    num_hidden = len(hidden_weights)

    x = jnp.asarray(x, jnp.float32)

    # ----- constant prep: fold the NTK scaling into the parameters (f32) -----
    # (1/f) * (alpha @ W.T + b) + beta * b  ==  alpha @ (W/f).T + (1/f + beta) * b
    operands = []
    param_specs = []
    const2d = lambda i: (0, 0)  # weights/biases stay resident across batch tiles
    for w, b in zip(hidden_weights, hidden_biases):
        fan_in = float(w.shape[1])            # layer.weight.shape[1]
        w_c = jnp.asarray(w, jnp.float32) * (1.0 / fan_in)
        b_c = (jnp.asarray(b, jnp.float32) * (1.0 / fan_in + float(beta))).reshape(-1, 1)
        operands.extend([w_c, b_c])
        param_specs.extend([pl.BlockSpec(w_c.shape, const2d),
                            pl.BlockSpec(b_c.shape, const2d)])
    w_out_c = jnp.asarray(w_out, jnp.float32)
    b_out_c = jnp.asarray(b_out, jnp.float32).reshape(-1, 1)
    operands.extend([w_out_c, b_out_c])
    param_specs.extend([pl.BlockSpec(w_out_c.shape, const2d),
                        pl.BlockSpec(b_out_c.shape, const2d)])

    # ----- batch padding so every tile is a full 128-lane multiple -----
    n_pad = max(128, _round_up(n, 128))
    if n_pad != n:
        x = jnp.pad(x, ((0, n_pad - n), (0, 0)))

    # ----- tile-size selection (VMEM budgeted, >=2 tiles for v7x megacore) -----
    max_h = max([input_dim, output_dim] + [int(w.shape[0]) for w in hidden_weights])
    per_row_bytes = (2 * input_dim * 4      # x double-buffer (f32)
                     + 2 * output_dim * 4   # out double-buffer (f32)
                     + 3 * max_h * 4)       # live activation temporaries (f32)
    vmem_tile_budget = 32 << 20             # conservative across v5e/v6e/v7x
    tb_cap = max(128, (vmem_tile_budget // per_row_bytes) // 128 * 128)
    tb = min(int(batch_tile), tb_cap, n_pad)
    tb = max(128, (tb // 128) * 128)
    # v7x: ensure >=2 batch tiles so ("parallel",) can use both TensorCores.
    if n_pad > 128 and pl.cdiv(n_pad, tb) < 2:
        tb = max(128, _round_up(pl.cdiv(n_pad, 2), 128))
    grid = (pl.cdiv(n_pad, tb),)

    weight_bytes = sum(int(o.size) * 4 for o in operands)
    vmem_est = tb * per_row_bytes + weight_bytes
    vmem_limit = int(min(56 << 20, max(32 << 20, 2 * vmem_est)))

    in_specs = ([pl.BlockSpec((tb, input_dim), lambda i: (i, 0))]  # batch-major x tile
                + param_specs)
    out_spec = pl.BlockSpec((output_dim, tb), lambda i: (0, i))    # lane-dense store

    kernel = functools.partial(_ntk_mlp_kernel, num_hidden=num_hidden)

    out_fm = pl.pallas_call(
        kernel,
        out_shape=jax.ShapeDtypeStruct((output_dim, n_pad), jnp.float32),
        grid=grid,
        in_specs=in_specs,
        out_specs=out_spec,
        compiler_params=pltpu.CompilerParams(
            dimension_semantics=("parallel",),   # independent batch tiles
            vmem_limit_bytes=vmem_limit,
        ),
    )(x, *operands)

    if n_pad != n:
        out_fm = out_fm[:, :n]
    if feature_major_output:
        return out_fm                      # (output_dim, N) — zero extra HBM traffic
    return out_fm.T                        # (N, output_dim) to match the module


def reference_forward(x, hidden_weights, hidden_biases, w_out, b_out, *, beta):
    alpha = x
    for w, b in zip(hidden_weights, hidden_biases):
        fan_in = w.shape[1]
        alpha_tilde = (1.0 / fan_in) * (alpha @ w.T + b) + beta * b
        alpha = jnp.maximum(alpha_tilde, 0.0)
    return alpha @ w_out.T + b_out


if __name__ == "__main__":
    # Model hyper-parameters (model_args)
    input_dim = 16
    hidden_dims = [32, 32]
    output_dim = 8
    sigma = 0.1
    beta = 0.5
    batch = 256  # small demo batch; splits into two 128-row lane-dense tiles

    key = jax.random.PRNGKey(0)
    n_param_keys = 2 * (len(hidden_dims) + 1)
    keys = jax.random.split(key, n_param_keys + 1)

    # Deterministic N(0, sigma) init, mirroring _initialize_weights(),
    # in the native PyTorch (out, in) weight layout.
    hidden_weights, hidden_biases = [], []
    prev = input_dim
    ki = 0
    for h in hidden_dims:
        hidden_weights.append(sigma * jax.random.normal(keys[ki], (h, prev), jnp.float32)); ki += 1
        hidden_biases.append(sigma * jax.random.normal(keys[ki], (h,), jnp.float32)); ki += 1
        prev = h
    w_out = sigma * jax.random.normal(keys[ki], (output_dim, prev), jnp.float32); ki += 1
    b_out = sigma * jax.random.normal(keys[ki], (output_dim,), jnp.float32); ki += 1

    x = jax.random.normal(keys[ki], (batch, input_dim), jnp.float32)

    out = ntk_choice_forward(x, hidden_weights, hidden_biases, w_out, b_out, beta=beta)
    out = jax.block_until_ready(out)

    ref = reference_forward(x, hidden_weights, hidden_biases, w_out, b_out, beta=beta)
    assert out.shape == (batch, output_dim)
    max_diff = float(jnp.max(jnp.abs(out - ref)))
    # All-f32 kernel; small residual deltas come only from matmul pass ordering.
    assert jnp.allclose(out, ref, atol=2e-3, rtol=1e-2), \
        f"mismatch vs reference (max abs diff {max_diff})"

    # TODO(synk): fit()/evaluate()/Adam training loop are host-side training code, not kernel work.
    print("KERNEL_OK")
</pallas_src>

<mosaic_0001>
module attributes {stable_mosaic.version = 11 : i64} {
  func.func @_ntk_mlp_kernel(%arg0: i32, %arg1: memref<128x16xf32, #tpu.memory_space<vmem>>, %arg2: memref<32x16xf32, #tpu.memory_space<vmem>>, %arg3: memref<32x1xf32, #tpu.memory_space<vmem>>, %arg4: memref<32x32xf32, #tpu.memory_space<vmem>>, %arg5: memref<32x1xf32, #tpu.memory_space<vmem>>, %arg6: memref<8x32xf32, #tpu.memory_space<vmem>>, %arg7: memref<8x1xf32, #tpu.memory_space<vmem>>, %arg8: memref<8x128xf32, #tpu.memory_space<vmem>>) attributes {dimension_semantics = [#tpu.dimension_semantics<parallel>], iteration_bounds = array<i64: 2>, scalar_prefetch = 0 : i64, scratch_operands = 0 : i64, tpu.core_type = #tpu.core_type<tc>, window_params = [{transform_indices = @transform_0, window_bounds = array<i64: 128, 16>}, {pipeline_mode = #tpu.pipeline_mode<synchronous>, transform_indices = @transform_1, window_bounds = array<i64: 32, 16>}, {pipeline_mode = #tpu.pipeline_mode<synchronous>, transform_indices = @transform_2, window_bounds = array<i64: 32, 1>}, {pipeline_mode = #tpu.pipeline_mode<synchronous>, transform_indices = @transform_3, window_bounds = array<i64: 32, 32>}, {pipeline_mode = #tpu.pipeline_mode<synchronous>, transform_indices = @transform_4, window_bounds = array<i64: 32, 1>}, {pipeline_mode = #tpu.pipeline_mode<synchronous>, transform_indices = @transform_5, window_bounds = array<i64: 8, 32>}, {pipeline_mode = #tpu.pipeline_mode<synchronous>, transform_indices = @transform_6, window_bounds = array<i64: 8, 1>}, {transform_indices = @transform_7, window_bounds = array<i64: 8, 128>}]} {
    %c0 = arith.constant 0 : index
    %c0_0 = arith.constant 0 : index
    %0 = vector.load %arg1[%c0, %c0_0] : memref<128x16xf32, #tpu.memory_space<vmem>>, vector<128x16xf32>
    %c0_1 = arith.constant 0 : index
    %c0_2 = arith.constant 0 : index
    %1 = vector.load %arg2[%c0_1, %c0_2] : memref<32x16xf32, #tpu.memory_space<vmem>>, vector<32x16xf32>
    %c0_3 = arith.constant 0 : index
    %c0_4 = arith.constant 0 : index
    %2 = vector.load %arg3[%c0_3, %c0_4] : memref<32x1xf32, #tpu.memory_space<vmem>>, vector<32x1xf32>
    %cst = arith.constant dense<0.000000e+00> : vector<32x128xf32>
    %3 = tpu.matmul %1, %0, %cst {dimension_numbers = #tpu.dot_dimension_numbers<[1], [1], [0], [0], [0, 0, 1, 0], [], []>} : vector<32x16xf32>, vector<128x16xf32>, vector<32x128xf32> -> vector<32x128xf32>
    %4 = vector.broadcast %2 : vector<32x1xf32> to vector<32x128xf32>
    %5 = arith.addf %3, %4 : vector<32x128xf32>
    %cst_5 = arith.constant 0.000000e+00 : f32
    %6 = vector.broadcast %cst_5 : f32 to vector<32x128xf32>
    %7 = arith.maximumf %5, %6 : vector<32x128xf32>
    %c0_6 = arith.constant 0 : index
    %c0_7 = arith.constant 0 : index
    %8 = vector.load %arg4[%c0_6, %c0_7] : memref<32x32xf32, #tpu.memory_space<vmem>>, vector<32x32xf32>
    %c0_8 = arith.constant 0 : index
    %c0_9 = arith.constant 0 : index
    %9 = vector.load %arg5[%c0_8, %c0_9] : memref<32x1xf32, #tpu.memory_space<vmem>>, vector<32x1xf32>
    %cst_10 = arith.constant dense<0.000000e+00> : vector<32x128xf32>
    %10 = tpu.matmul %8, %7, %cst_10 {dimension_numbers = #tpu.dot_dimension_numbers<[1], [0], [0], [1], [0, 0, 1, 1], [], []>} : vector<32x32xf32>, vector<32x128xf32>, vector<32x128xf32> -> vector<32x128xf32>
    %11 = vector.broadcast %9 : vector<32x1xf32> to vector<32x128xf32>
    %12 = arith.addf %10, %11 : vector<32x128xf32>
    %cst_11 = arith.constant 0.000000e+00 : f32
    %13 = vector.broadcast %cst_11 : f32 to vector<32x128xf32>
    %14 = arith.maximumf %12, %13 : vector<32x128xf32>
    %c0_12 = arith.constant 0 : index
    %c0_13 = arith.constant 0 : index
    %15 = vector.load %arg6[%c0_12, %c0_13] : memref<8x32xf32, #tpu.memory_space<vmem>>, vector<8x32xf32>
    %c0_14 = arith.constant 0 : index
    %c0_15 = arith.constant 0 : index
    %16 = vector.load %arg7[%c0_14, %c0_15] : memref<8x1xf32, #tpu.memory_space<vmem>>, vector<8x1xf32>
    %cst_16 = arith.constant dense<0.000000e+00> : vector<8x128xf32>
    %17 = tpu.matmul %15, %14, %cst_16 {dimension_numbers = #tpu.dot_dimension_numbers<[1], [0], [0], [1], [0, 0, 1, 1], [], []>} : vector<8x32xf32>, vector<32x128xf32>, vector<8x128xf32> -> vector<8x128xf32>
    %18 = vector.broadcast %16 : vector<8x1xf32> to vector<8x128xf32>
    %19 = arith.addf %17, %18 : vector<8x128xf32>
    %c0_17 = arith.constant 0 : index
    %c0_18 = arith.constant 0 : index
    %20 = vector.load %arg8[%c0_17, %c0_18] : memref<8x128xf32, #tpu.memory_space<vmem>>, vector<8x128xf32>
    tpu.vector_store %arg8[%c0_17, %c0_18], %19 {strides = array<i32>} : memref<8x128xf32, #tpu.memory_space<vmem>>, vector<8x128xf32>,
    return
  }
  func.func @transform_0(%arg0: i32) -> (i32, i32) {
    %c0_i32 = arith.constant 0 : i32
    %c0_i32_0 = arith.constant 0 : i32
    return %arg0, %c0_i32 : i32, i32
  }
  func.func @transform_1(%arg0: i32) -> (i32, i32) {
    %c0_i32 = arith.constant 0 : i32
    %c0_i32_0 = arith.constant 0 : i32
    %c0_i32_1 = arith.constant 0 : i32
    return %c0_i32, %c0_i32_0 : i32, i32
  }
  func.func @transform_2(%arg0: i32) -> (i32, i32) {
    %c0_i32 = arith.constant 0 : i32
    %c0_i32_0 = arith.constant 0 : i32
    %c0_i32_1 = arith.constant 0 : i32
    return %c0_i32, %c0_i32_0 : i32, i32
  }
  func.func @transform_3(%arg0: i32) -> (i32, i32) {
    %c0_i32 = arith.constant 0 : i32
    %c0_i32_0 = arith.constant 0 : i32
    %c0_i32_1 = arith.constant 0 : i32
    return %c0_i32, %c0_i32_0 : i32, i32
  }
  func.func @transform_4(%arg0: i32) -> (i32, i32) {
    %c0_i32 = arith.constant 0 : i32
    %c0_i32_0 = arith.constant 0 : i32
    %c0_i32_1 = arith.constant 0 : i32
    return %c0_i32, %c0_i32_0 : i32, i32
  }
  func.func @transform_5(%arg0: i32) -> (i32, i32) {
    %c0_i32 = arith.constant 0 : i32
    %c0_i32_0 = arith.constant 0 : i32
    %c0_i32_1 = arith.constant 0 : i32
    return %c0_i32, %c0_i32_0 : i32, i32
  }
  func.func @transform_6(%arg0: i32) -> (i32, i32) {
    %c0_i32 = arith.constant 0 : i32
    %c0_i32_0 = arith.constant 0 : i32
    %c0_i32_1 = arith.constant 0 : i32
    return %c0_i32, %c0_i32_0 : i32, i32
  }
  func.func @transform_7(%arg0: i32) -> (i32, i32) {
    %c0_i32 = arith.constant 0 : i32
    %c0_i32_0 = arith.constant 0 : i32
    return %c0_i32, %arg0 : i32, i32
  }
}

</mosaic_0001>

<bundles_post_ra>
// kernel: tpu_custom_call.1
= control target key start
LH: loop header
LB: loop body
LE: loop exit
PB: predicated region body
PF: predicated region fallthrough
CT: control target
= control target key end

     0   :  { %12 = vsyncpa [#allocation3], 0  ;;  %s1244_s0 = inlined_call_operand.vmem [shape: f32[256,16], index: 0, kind: input, shape index: {}]   ;;  %s1245_s1 = inlined_call_operand.vmem [shape: f32[32,16], index: 1, kind: input, shape index: {}]   ;;  %s1246_s2 = inlined_call_operand.vmem [shape: f32[32,1], index: 2, kind: input, shape index: {}]   ;;  %s1247_s3 = inlined_call_operand.vmem [shape: f32[32,32], index: 3, kind: input, shape index: {}]   ;;  %s1248_s4 = inlined_call_operand.vmem [shape: f32[32,1], index: 4, kind: input, shape index: {}]   ;;  %s1249_s5 = inlined_call_operand.vmem [shape: f32[8,32], index: 5, kind: input, shape index: {}]   ;;  %s1250_s6 = inlined_call_operand.vmem [shape: f32[8,1], index: 6, kind: input, shape index: {}]   ;;  %s1251_s7 = inlined_call_operand.hbm [shape: f32[8,256], index: 7, kind: output, shape index: {}]  }
   0x1   :  { %14 = vsyncpa [#allocation3 + $0x1], 0  ;;  %s1039_s24 = smov 0   ;;  %s1041_s25 = smov 0  }
   0x2   :  { %s1043_s26 = smov 0   ;;  %s1045_s27 = smov 0  }
   0x3 LB: > { %s1060_s28 = sadd.s32 4294967295, %s993_s27   ;;  %s757_s29 = sadd.s32 4294967294, %s993_s27   ;;  %s993_s27 = sphi %s1045_s27, %s1257_s27   ;;  %s989_s26 = sphi %s1043_s26, %s1256_s26   ;;  %s985_s25 = sphi %s1041_s25, %s1255_s25   ;;  %s981_s24 = sphi %s1039_s24, %s1254_s24  }
   0x4   : > { %s1064_s30 = sadd.s32 1, %s993_s27   ;;  %s179_s8 = sadd.s32 1, %s989_s26 }
   0x5   : > { %s176_s9 = ssub.s32 %s993_s27, %s1064_s30  ;;  %p189_p0 = scmp.ne.s32.totalorder %s989_s26, %s985_s25 }
   0x6   : > { %p177_p1 = scmp.eq.s32.totalorder %s176_s9, 0  ;;  %p190_p2 = scmp.eq.s32.totalorder %s1060_s28, 1 }
   0x7   : > { %p195_p3 = scmp.ne.s32.totalorder %s985_s25, %s981_s24  ;;  %p196_p4 = scmp.eq.s32.totalorder %s757_s29, 1 }
   0x8   : > { %s1075_s10 = scalar_select %p177_p1, %s989_s26, %s179_s8  }
   0x9   : > { %p1077_p5 = por %p190_p2, %p189_p0  ;;  %p1081_p6 = por %p196_p4, %p195_p3 }
   0xa   : > { %p760_p7 = scmp.ge.s32.totalorder %s993_s27, 1  ;;  %p241_p8 = scmp.lt.s32.totalorder %s993_s27, 3 }
   0xc   : > { %p242_p9 = pnand %p760_p7, %p241_p8 }
   0xd   : > { %s762_s13 = sshll.u32 (!%p242_p9), %s1060_s28, 4  ;;  %s270_s9 = sand.u32 (!%p242_p9), 1, %s985_s25  }
   0xe   : > { %245 = sbr.rel (%p242_p9) target bundleno = 712 (0x2c8), region = 48  ;;  %p274_p10 = scmp.lt.s32.totalorder (!%p242_p9), %s762_s13, 31 }
   0xf   : > { %s761_s15 = sshll.u32 (!%p242_p9), %s270_s9, 3  ;;  %s790_s16 = sshll.u32 (!%p242_p9), %s1060_s28, 7 }
  0x10   : > { %s1209_s19 = scalar_lea.hbm (!%p242_p9), %s1251_s7, %s790_s16  ;;  %s685_s20 = scalar_lea.sflag (!%p242_p9), [#allocation3], %s270_s9 }
  0x11   : > { %s998_s28 = smov (!%p242_p9), [#allocation2]  }
  0x12   : > { %s937_s22 = sshll.u32 (!%p242_p9), %s998_s28, 4  ;;  %s938_s22 = int_to_ptr.vmem [resolvable:$false] %s937_s22 }
  0x13   : > { %vm323_vm0 = vcmask 130048   ;;  %v295_v0 = vld [vmem:[%s1245_s1] sm:$0xff]  ;;  %v995_v1 = vmov 0   ;;  %v302_v2 = vld [vmem:[%s1246_s2 + $0x18] sm:$0xff]  ;;  %v300_v3 = vld [vmem:[%s1246_s2 + $0x8] sm:$0xff]  ;;  %s1259_s13 = smov (!%p274_p10, %s762_s13), 31 }
  0x14   : > { %858 = vmatprep.mubr.msk.f32.mxu0 %vm323_vm0, %v295_v0  ;;  %931 = vset.pattern.permute.xlu0 %v995_v1  ;;  %v301_v4 = vld [vmem:[%s1246_s2 + $0x10] sm:$0xff]  ;;  %v299_v5 = vld [vmem:[%s1246_s2] sm:$0xff]  ;;  %s763_s29 = sshll.u32 %s1259_s13, 3  ;;  %v480_v8 = vld [vmem:[%s1248_s4 + $0x18] sm:$0xff]  ;;  %vm501_vm1 = vcmask 261120   ;;  %v996_v50 = vmov 0.0  }
  0x15   : > { %320 = vperm.xlu0 %931, %v302_v2   ;;  %932 = vset.pattern.permute.xlu1 %v995_v1  ;;  %s1107_s14 = scalar_lea.vmem %s1244_s0, %s763_s29  ;;  %v479_v9 = vld [vmem:[%s1248_s4 + $0x10] sm:$0xff]  ;;  %v478_v11 = vld [vmem:[%s1248_s4 + $0x8] sm:$0xff]  ;;  %v477_v12 = vld [vmem:[%s1248_s4] sm:$0xff]  ;;  %vm997_vm2 = vmmov 0   ;;  %s939_s23 = scalar_lea.vmem %s938_s22, 256 }
  0x16   : > { %310 = vperm.xlu1 %932, %v300_v3   ;;  %v294_v6 = vld [vmem:[%s1107_s14 + $0x78] sm:$0xff]  ;;  %v293_v7 = vld [vmem:[%s1107_s14 + $0x70] sm:$0xff]  ;;  %v292_v10 = vld [vmem:[%s1107_s14 + $0x68] sm:$0xff] }
  0x17   : > { %826 = vmatprep.subr.msk.mxu0 %vm323_vm0, %v294_v6  ;;  %v291_v13 = vld [vmem:[%s1107_s14 + $0x60] sm:$0xff]  ;;  %v290_v15 = vld [vmem:[%s1107_s14 + $0x58] sm:$0xff]  ;;  %v289_v16 = vld [vmem:[%s1107_s14 + $0x50] sm:$0xff] }
  0x18   : > { %827 = vmatpush3.xpose.msk.msra.mxu0 %vm323_vm0, %v294_v6  ;;  %v604_v14 = vld [vmem:[%s1250_s6] sm:$0xff]  ;;  %v288_v17 = vld [vmem:[%s1107_s14 + $0x48] sm:$0xff]  ;;  %v286_v19 = vld [vmem:[%s1107_s14 + $0x38] sm:$0xff] }
  0x19   : > { %315 = vperm.xlu0 %931, %v301_v4   ;;  %828 = vmatprep.subr.msk.mxu0 %vm323_vm0, %v293_v7  ;;  %v287_v18 = vld [vmem:[%s1107_s14 + $0x40] sm:$0xff]  ;;  %v285_v20 = vld [vmem:[%s1107_s14 + $0x30] sm:$0xff]  ;;  %v284_v21 = vld [vmem:[%s1107_s14 + $0x28] sm:$0xff] }
  0x1a   : > { %305 = vperm.xlu1 %932, %v299_v5   ;;  %v283_v22 = vld [vmem:[%s1107_s14 + $0x20] sm:$0xff]  ;;  %v282_v23 = vld [vmem:[%s1107_s14 + $0x18] sm:$0xff]  ;;  %v281_v24 = vld [vmem:[%s1107_s14 + $0x10] sm:$0xff] }
  0x1b   : > { %v280_v25 = vld [vmem:[%s1107_s14 + $0x8] sm:$0xff]  ;;  %v279_v26 = vld [vmem:[%s1107_s14] sm:$0xff]  ;;  %v297_v28 = vld [vmem:[%s1245_s1 + $0x10] sm:$0xff]  ;;  %s272_s14 = scalar_lea.vmem [#allocation2], %s761_s15 }
  0x1c   : > { %829 = vmatpush3.xpose.msk.msra.mxu0 %vm323_vm0, %v293_v7  ;;  %v296_v27 = vld [vmem:[%s1245_s1 + $0x8] sm:$0xff]  ;;  %v298_v29 = vld [vmem:[%s1245_s1 + $0x18] sm:$0xff]  ;;  %v473_v30 = vld [vmem:[%s1247_s3] sm:$0xff]  ;;  %s698_s13 = sshll.u32 %s272_s14, 4  ;;  %s699_s13 = int_to_ptr.vmem [resolvable:$true] %s698_s13 }
  0x1d   : > { %498 = vperm.xlu0 %931, %v480_v8   ;;  %830 = vmatprep.subr.msk.mxu0 %vm323_vm0, %v292_v10  ;;  %v474_v47 = vld [vmem:[%s1247_s3 + $0x8] sm:$0xff]  ;;  %v475_v48 = vld [vmem:[%s1247_s3 + $0x10] sm:$0xff]  ;;  %v476_v49 = vld [vmem:[%s1247_s3 + $0x18] sm:$0xff]  ;;  %s933_s21 = scalar_lea.vmem %s699_s13, 128  ;;  %p940_p0 = scmp.lt.s32.totalorder %s699_s13, %s938_s22 }
  0x1e   : > { %493 = vperm.xlu1 %932, %v479_v9   ;;  %872 = vmatprep.mubr.msk.f32.mxu1 %vm501_vm1, %v473_v30  ;;  %v603_v3 = vld [vmem:[%s1249_s5] sm:$0xff]  ;;  %p934_p11 = scmp.ne.s32.totalorder %s699_s13, %s933_s21  ;;  %p941_p1 = scmp.lt.s32.totalorder %s939_s23, %s933_s21 }
  0x20   : > { %831 = vmatpush3.xpose.msk.msra.mxu0 %vm323_vm0, %v292_v10  ;;  %p935_p12 = pnand %p934_p11, %p1077_p5  ;;  %p942_p2 = por %p941_p1, %p940_p0 }
  0x21   : > { %488 = vperm.xlu0 %931, %v478_v11   ;;  %832 = vmatprep.subr.msk.mxu0 %vm323_vm0, %v291_v13 }
  0x22   : > { %483 = vperm.xlu1 %932, %v477_v12   ;;  %p936_p13 = pneg %p935_p12 }
  0x24   : > { %833 = vmatpush3.xpose.msk.msra.mxu0 %vm323_vm0, %v291_v13  ;;  %p943_p3 = pnand %p942_p2, %p936_p13 }
  0x25   : > { %607 = vperm.xlu0 %931, %v604_v14   ;;  %834 = vmatprep.subr.msk.mxu0 %vm323_vm0, %v290_v15 }
  0x28   : > { %835 = vmatpush3.xpose.msk.msra.mxu0 %vm323_vm0, %v290_v15 }
  0x29   : > { %836 = vmatprep.subr.msk.mxu0 %vm323_vm0, %v289_v16 }
  0x2c   : > { %837 = vmatpush3.xpose.msk.msra.mxu0 %vm323_vm0, %v289_v16 }
  0x2d   : > { %838 = vmatprep.subr.msk.mxu0 %vm323_vm0, %v288_v17 }
  0x30   : > { %839 = vmatpush3.xpose.msk.msra.mxu0 %vm323_vm0, %v288_v17 }
  0x31   : > { %840 = vmatprep.subr.msk.mxu0 %vm323_vm0, %v287_v18 }
  0x34   : > { %841 = vmatpush3.xpose.msk.msra.mxu0 %vm323_vm0, %v287_v18 }
  0x35   : > { %842 = vmatprep.subr.msk.mxu0 %vm323_vm0, %v286_v19 }
  0x38   : > { %843 = vmatpush3.xpose.msk.msra.mxu0 %vm323_vm0, %v286_v19 }
  0x39   : > { %844 = vmatprep.subr.msk.mxu0 %vm323_vm0, %v285_v20 }
  0x3c   : > { %845 = vmatpush3.xpose.msk.msra.mxu0 %vm323_vm0, %v285_v20 }
  0x3d   : > { %846 = vmatprep.subr.msk.mxu0 %vm323_vm0, %v284_v21 }
  0x40   : > { %847 = vmatpush3.xpose.msk.msra.mxu0 %vm323_vm0, %v284_v21 }
  0x41   : > { %848 = vmatprep.subr.msk.mxu0 %vm323_vm0, %v283_v22 }
  0x44   : > { %849 = vmatpush3.xpose.msk.msra.mxu0 %vm323_vm0, %v283_v22 }
  0x45   : > { %850 = vmatprep.subr.msk.mxu0 %vm323_vm0, %v282_v23 }
  0x48   : > { %851 = vmatpush3.xpose.msk.msra.mxu0 %vm323_vm0, %v282_v23 }
  0x49   : > { %852 = vmatprep.subr.msk.mxu0 %vm323_vm0, %v281_v24 }
  0x4c   : > { %853 = vmatpush3.xpose.msk.msra.mxu0 %vm323_vm0, %v281_v24 }
  0x4d   : > { %854 = vmatprep.subr.msk.mxu0 %vm323_vm0, %v280_v25 }
  0x50   : > { %855 = vmatpush3.xpose.msk.msra.mxu0 %vm323_vm0, %v280_v25 }
  0x51   : > { %856 = vmatprep.subr.msk.mxu0 %vm323_vm0, %v279_v26 }
  0x54   : > { %857 = vmatpush3.xpose.msk.msra.mxu0 %vm323_vm0, %v279_v26 }
  0x57   : > { %859 = vmatmul.mubr.msk.f32.vlgmr.msra.gmra.mxu0 %vm323_vm0, %v296_v27 }
  0x58   : > { %861 = vmatprep.mubr.msk.f32.mxu0 %vm323_vm0, %v297_v28 }
  0x5b   : > { %862 = vmatmul.mubr.msk.f32.gmra.mxu0 %vm323_vm0, %v298_v29 }
  0x90   : > { %v321_v31 = vpop.permute.xlu0 %320 }
  0x91   : > { %v311_v33 = vpop.permute.xlu1 %310 }
  0x94   : > { %v316_v37 = vpop.permute.xlu0 %315 }
  0x95   : > { %v306_v42 = vpop.permute.xlu1 %305 }
  0x98   : > { %v499_v51 = vpop.permute.xlu0 %498 }
  0x99   : > { %v494_v53 = vpop.permute.xlu1 %493 }
  0x9c   : > { %v489_v57 = vpop.permute.xlu0 %488 }
  0x9d   : > { %v484_v62 = vpop.permute.xlu1 %483 }
  0xa0   : > { %v608_v4 = vpop.permute.xlu0 %607 }
 0x117   : > { %v860_v32 = vpop.f32.mrf.mxu0 }
 0x118   : > { %v456_v39 = vadd.f32 %v860_v32, %v311_v33 }
 0x119   : > { %v450_v34 = vpop.f32.mrf.mxu0 }
 0x11a   : > { %v451_v43 = vadd.f32 %v450_v34, %v306_v42  ;;  %v470_v45 = vmax.f32 %v456_v39, 0.0 }
 0x11b   : > { %v863_v35 = vpop.f32.mrf.mxu0 }
 0x11c   : > { %v466_v36 = vadd.f32 %v863_v35, %v321_v31  ;;  %v469_v46 = vmax.f32 %v451_v43, 0.0 }
 0x11d   : > { %v460_v38 = vpop.f32.mrf.mxu0 }
 0x11e   : > { %v472_v40 = vmax.f32 %v466_v36, 0.0  ;;  %v461_v41 = vadd.f32 %v460_v38, %v316_v37 }
 0x120   : > { %v471_v44 = vmax.f32 %v461_v41, 0.0  ;;  %864 = vmatprep.subr.mxu1 %v472_v40 }
 0x121   : > { %865 = vmatpush3.msra.mxu1 %v472_v40 }
 0x122   : > { %866 = vmatprep.subr.mxu1 %v471_v44 }
 0x123   : > { %867 = vmatpush3.msra.mxu1 %v471_v44 }
 0x124   : > { %868 = vmatprep.subr.mxu1 %v470_v45 }
 0x125   : > { %869 = vmatpush3.msra.mxu1 %v470_v45 }
 0x126   : > { %870 = vmatprep.subr.mxu1 %v469_v46 }
 0x127   : > { %871 = vmatpush3.msra.mxu1 %v469_v46 }
 0x128   : > { %873 = vmatmul.mubr.msk.f32.vlgmr.msra.gmra.mxu1 %vm501_vm1, %v474_v47  ;;  %878 = vmatprep.subr.mxu1 %v996_v50 }
 0x129   : > { %875 = vmatprep.mubr.msk.f32.mxu1 %vm501_vm1, %v475_v48 }
 0x12c   : > { %876 = vmatmul.mubr.msk.f32.gmra.mxu1 %vm501_vm1, %v476_v49 }
 0x12d   : > { %886 = vmatprep.mubr.msk.f32.mxu1 %vm997_vm2, %v996_v50 }
 0x1e8   : > { %v874_v52 = vpop.f32.mrf.mxu1 }
 0x1e9   : > { %v586_v59 = vadd.f32 %v874_v52, %v489_v57 }
 0x1ea   : > { %v580_v54 = vpop.f32.mrf.mxu1 }
 0x1eb   : > { %v581_v63 = vadd.f32 %v580_v54, %v484_v62  ;;  %v600_v1 = vmax.f32 %v586_v59, 0.0 }
 0x1ec   : > { %v877_v55 = vpop.f32.mrf.mxu1 }
 0x1ed   : > { %v596_v56 = vadd.f32 %v877_v55, %v499_v51  ;;  %v599_v2 = vmax.f32 %v581_v63, 0.0 }
 0x1ee   : > { %v590_v58 = vpop.f32.mrf.mxu1 }
 0x1ef   : > { %v602_v60 = vmax.f32 %v596_v56, 0.0  ;;  %v591_v61 = vadd.f32 %v590_v58, %v494_v53 }
 0x1f1   : > { %v601_v0 = vmax.f32 %v591_v61, 0.0  ;;  %879 = vmatpush3.msra.mxu1 %v602_v60 }
 0x1f2   : > { %880 = vmatprep.subr.mxu1 %v996_v50 }
 0x1f3   : > { %881 = vmatpush3.msra.mxu1 %v601_v0 }
 0x1f4   : > { %882 = vmatprep.subr.mxu1 %v996_v50 }
 0x1f5   : > { %883 = vmatpush3.msra.mxu1 %v600_v1 }
 0x1f6   : > { %884 = vmatprep.subr.mxu1 %v996_v50 }
 0x1f7   : > { %885 = vmatpush3.msra.mxu1 %v599_v2 }
 0x1f8   : > { %887 = vmatmul.mubr.msk.f32.vlgmr.msra.gmra.mxu1 %vm501_vm1, %v603_v3 }
 0x2b8   : > { %v679_v5 = vpop.f32.mrf.mxu1 }
 0x2b9   : > { %v680_v6 = vadd.f32 %v679_v5, %v608_v4 }
 0x2ba   : > { %v888_v7 = vpop.f32.mrf.mxu1 }
 0x2bb   : > { %683 = vst [vmem:[%s272_s14] sm:$0xff] %v680_v6 }
 0x2bc   : > { %946 = shalt.err (!%p943_p3)
}
 0x2bd   : > { %s947_s29 = scalar_lea.hbm %s1209_s19, 128  ;;  %s951_s15 = scalar_lea.hbm %s1251_s7, 256 }
 0x2be   : > { %p948_p4 = scmp.ne.s32.totalorder %s1209_s19, %s947_s29  ;;  %p952_p9 = scmp.lt.s32.totalorder %s1209_s19, %s1251_s7 }
 0x2bf   : > { %p953_p10 = scmp.lt.s32.totalorder %s951_s15, %s947_s29 }
 0x2c0   : > { %p949_p7 = pnand %p948_p4, %p1077_p5 }
 0x2c1   : > { %p954_p11 = por %p953_p10, %p952_p9 }
 0x2c2   : > { %p950_p8 = pneg %p949_p7 }
 0x2c4   : > { %p955_p12 = pnand %p954_p11, %p950_p8 }
 0x2c6   : > { %958 = shalt.err (!%p955_p12)
}
 0x2c7   : > { %889 = dma.vmem_to_hbm [thread:$0]  (%p1077_p5), %s699_s13, 128, %s1209_s19, %s685_s20  }
 0x2c8 PF: > { %p895_p13 = scmp.ge.s32.totalorder %s993_s27, 2  ;;  %s710_s17 = sand.u32 1, %s981_s24  }
 0x2c9   : > { %s711_s18 = scalar_lea.sflag [#allocation3], %s710_s17 }
 0x2ca   : > { %p892_p0 = pnand %p895_p13, %p1081_p6 }
 0x2cc   : > { %p893_p1 = pneg %p892_p0 }
 0x2ce   : > { %976 = dma.done.wait (%p893_p1), %s711_s18, 128  }
 0x2cf   : > { %978 = vsyncadd (%p893_p1), %s711_s18, 4294967168  ;;  %p17_p2 = scmp.ge.s32.totalorder %s1064_s30, 4   ;;  %s1254_s24 = smov %s985_s25 }
 0x2d0   : > { %s1255_s25 = smov %s989_s26  ;;  %s1256_s26 = smov %s1075_s10 }
 0x2d1   : > { %s1257_s27 = smov %s1064_s30  ;;  %19 = sbr.rel (!%p17_p2) target bundleno = 3 (0x3), region = 83 }
 0x2d6   :  { %716 = vsyncpa [#allocation3], 1 }
 0x2d7   :  { %718 = vsyncpa [#allocation3 + $0x1], 1 }

</bundles_post_ra>
